<compile_context>
chip_gen: v7x
topology: tpu7x:2x2x1
jax: 0.10.0
libtpu: 0.0.40
codegen_flags: <defaults>
</compile_context>

<pallas_src>
import jax
import jax.numpy as jnp
from jax.experimental import pallas as pl
from jax.experimental.pallas import tpu as pltpu

LANE = 128


# ----------------------------- Pallas kernel --------------------------------

def _qnet_fused_kernel(x_ref, wih_ref, whh_ref, bih_ref, bhh_ref,
                       w1_ref, b1_ref, w2_ref, b2_ref, w3_ref, b3_ref,
                       out_ref, h_scr):
    """Fused tanh-RNN (last hidden state) + 3-layer MLP head.

    x_ref:   (T, N)      time-major scalar inputs, N = B*S rows ordered s-major
    wih:     (1, F)      input-to-hidden weights (input_size = 1)
    whh:     (F, F)      hidden-to-hidden weights
    bih/bhh: (1, F)      RNN biases
    w1:      (S*F, H1)   q_net layer 1 (rows grouped per stock s)
    w2:      (H1, H2)    q_net layer 2
    w3:      (H2, OUTP)  q_net layer 3, columns zero-padded to a lane multiple
    out:     (B, OUTP)   padded Q-values (first action_dim columns are valid)
    h_scr:   (N, F)      VMEM scratch holding the last hidden state
    """
    T, N = x_ref.shape
    F = whh_ref.shape[0]
    B = out_ref.shape[0]
    S = N // B
    H1 = w1_ref.shape[1]

    # ---- hoisted, loop-invariant work (done once, not per timestep) --------
    whh = whh_ref[...]                                           # (F, F)
    wih = wih_ref[...].reshape(1, 1, F)                          # (1, 1, F)
    bias = (bih_ref[...] + bhh_ref[...]).reshape(1, 1, F)        # (1, 1, F)
    x = x_ref[...]                                               # (T, N)
    # Full input projection + bias for every timestep in one vectorized op.
    xwb = x[:, :, None] * wih + bias                             # (T, N, F)

    # ---- recurrence, fully unrolled (T is small and static) ----------------
    # h_1 = tanh(x_1*W_ih + b) since h_0 == 0 (skips a zero matmul).
    h = jnp.tanh(xwb[0])
    for t in range(1, T):
        h = jnp.tanh(xwb[t] +
                     jnp.dot(h, whh, preferred_element_type=jnp.float32))
    h_scr[...] = h                                               # (N, F)

    # ---- q_net MLP: (B, S*F) -> H1 -> H2 -> OUTP ----------------------------
    # feats[b, s*F:(s+1)*F] = h[s*B + b]  (rows are s-major), so layer 1 is
    # decomposed as sum_s h_s @ W1_s with contiguous static slices — no
    # in-kernel reshape of the hidden state is needed.
    acc1 = jnp.zeros((B, H1), dtype=jnp.float32)
    for s in range(S):
        h_s = h_scr[s * B:(s + 1) * B, :]                        # (B, F)
        w1_s = w1_ref[s * F:(s + 1) * F, :]                      # (F, H1)
        acc1 = acc1 + jnp.dot(h_s, w1_s, preferred_element_type=jnp.float32)
    h1 = jnp.maximum(acc1 + b1_ref[...], 0.0)
    h2 = jnp.maximum(
        jnp.dot(h1, w2_ref[...], preferred_element_type=jnp.float32)
        + b2_ref[...], 0.0)
    # Final store is lane-dense (OUTP is a multiple of 128).
    out_ref[...] = (jnp.dot(h2, w3_ref[...], preferred_element_type=jnp.float32)
                    + b3_ref[...])


# ------------------------------ wrapper --------------------------------------

def _full_spec(shape):
    # whole-array block, single grid point
    return pl.BlockSpec(shape, lambda i: tuple(0 for _ in shape))


def qnetwork_forward(obs, params):
    """QNetwork.forward for strategy='concat'.

    obs: (B, lookback, stock_num) float32
    returns: (B, action_dim) float32 Q-values
    """
    B, T, S = obs.shape
    F = params["w_hh"].shape[0]
    H1 = params["w1"].shape[1]
    H2 = params["w2"].shape[1]
    A = params["w3"].shape[1]
    N = B * S

    # PyTorch: obs.reshape(B*S, lookback) is a raw row-major reshape of the
    # (B, T, S) tensor; reshaping directly to (B, S, T) is the identical
    # row-major reindexing.  Then regroup the RNN rows s-major (row s*B + b)
    # and go time-major so the kernel indexes the leading axis per step.
    x3 = jnp.reshape(obs, (B, S, T)).astype(jnp.float32)          # rows b*S+s
    x_t = jnp.transpose(x3, (2, 1, 0)).reshape(T, S * B)          # (T, N)

    # Pad the final layer to a lane-dense output width (multiple of 128);
    # slice back to action_dim afterwards (pure layout plumbing).
    outp = max(LANE, ((A + LANE - 1) // LANE) * LANE)
    w3p = jnp.zeros((H2, outp), jnp.float32).at[:, :A].set(params["w3"])
    b3p = jnp.zeros((1, outp), jnp.float32).at[:, :A].set(params["b3"])

    flops = int(2 * T * N * F                      # input projection
                + (T - 1) * 2 * N * F * F          # recurrence matmuls
                + 2 * B * S * F * H1               # layer 1
                + 2 * B * H1 * H2                  # layer 2
                + 2 * B * H2 * outp)               # layer 3
    transcendentals = int(T * N * F)               # tanh
    bytes_accessed = int(4 * (T * N + F + F * F + 2 * F + S * F * H1 + H1
                              + H1 * H2 + H2 + H2 * outp + outp + B * outp))

    q_pad = pl.pallas_call(
        _qnet_fused_kernel,
        out_shape=jax.ShapeDtypeStruct((B, outp), jnp.float32),
        grid=(1,),
        in_specs=[
            _full_spec((T, N)),
            _full_spec((1, F)),
            _full_spec((F, F)),
            _full_spec((1, F)),
            _full_spec((1, F)),
            _full_spec((S * F, H1)),
            _full_spec((1, H1)),
            _full_spec((H1, H2)),
            _full_spec((1, H2)),
            _full_spec((H2, outp)),
            _full_spec((1, outp)),
        ],
        out_specs=_full_spec((B, outp)),
        scratch_shapes=[pltpu.VMEM((N, F), jnp.float32)],
        compiler_params=pltpu.CompilerParams(
            dimension_semantics=("arbitrary",)),
        cost_estimate=pl.CostEstimate(flops=flops,
                                      transcendentals=transcendentals,
                                      bytes_accessed=bytes_accessed),
    )(x_t, params["w_ih"], params["w_hh"], params["b_ih"], params["b_hh"],
      params["w1"], params["b1"], params["w2"], params["b2"], w3p, b3p)

    return q_pad[:, :A]


# --------------------------- pure-JAX reference ------------------------------

def _qnetwork_reference(obs, params):
    B, T, S = obs.shape
    F = params["w_hh"].shape[0]
    x = jnp.reshape(obs, (B * S, T)).astype(jnp.float32)          # (N, T)
    h = jnp.zeros((B * S, F), jnp.float32)
    b = params["b_ih"] + params["b_hh"]
    for t in range(T):
        h = jnp.tanh(x[:, t:t + 1] * params["w_ih"] + h @ params["w_hh"] + b)
    feats = jnp.reshape(h, (B, S * F))
    h1 = jnp.maximum(feats @ params["w1"] + params["b1"], 0.0)
    h2 = jnp.maximum(h1 @ params["w2"] + params["b2"], 0.0)
    return h2 @ params["w3"] + params["b3"]


# ------------------------------ main -----------------------------------------

if __name__ == "__main__":
    # Small shapes consistent with the module:
    B, T, S = 2, 8, 4          # batch, lookback, stock_num
    F = 16                     # features_dim
    ACTION_DIM = 4             # action_space.n
    H1, H2 = 64, 64            # net_arch

    key = jax.random.PRNGKey(0)
    ks = jax.random.split(key, 11)

    obs = jax.random.normal(ks[0], (B, T, S), dtype=jnp.float32)

    scale = 0.1
    params = {
        # RNN (input_size=1, hidden_size=F); stored pre-transposed (x @ W).
        "w_ih": scale * jax.random.normal(ks[1], (1, F), dtype=jnp.float32),
        "w_hh": scale * jax.random.normal(ks[2], (F, F), dtype=jnp.float32),
        "b_ih": scale * jax.random.normal(ks[3], (1, F), dtype=jnp.float32),
        "b_hh": scale * jax.random.normal(ks[4], (1, F), dtype=jnp.float32),
        # q_net MLP: (F*S) -> 64 -> 64 -> action_dim
        "w1": scale * jax.random.normal(ks[5], (F * S, H1), dtype=jnp.float32),
        "b1": scale * jax.random.normal(ks[6], (1, H1), dtype=jnp.float32),
        "w2": scale * jax.random.normal(ks[7], (H1, H2), dtype=jnp.float32),
        "b2": scale * jax.random.normal(ks[8], (1, H2), dtype=jnp.float32),
        "w3": scale * jax.random.normal(ks[9], (H2, ACTION_DIM), dtype=jnp.float32),
        "b3": scale * jax.random.normal(ks[10], (1, ACTION_DIM), dtype=jnp.float32),
    }

    q_values = qnetwork_forward(obs, params)
    q_values = jax.block_until_ready(q_values)

    assert q_values.shape == (B, ACTION_DIM)
    assert q_values.dtype == jnp.float32

    q_ref = jax.block_until_ready(_qnetwork_reference(obs, params))
    assert jnp.allclose(q_values, q_ref, rtol=3e-2, atol=3e-2), (
        "mismatch vs. pure-JAX reference")

    print("KERNEL_OK")
</pallas_src>

<mosaic_0001>
module attributes {stable_mosaic.version = 11 : i64} {
  func.func @_qnet_fused_kernel(%arg0: i32, %arg1: memref<8x8xf32, #tpu.memory_space<vmem>>, %arg2: memref<1x16xf32, #tpu.memory_space<vmem>>, %arg3: memref<16x16xf32, #tpu.memory_space<vmem>>, %arg4: memref<1x16xf32, #tpu.memory_space<vmem>>, %arg5: memref<1x16xf32, #tpu.memory_space<vmem>>, %arg6: memref<64x64xf32, #tpu.memory_space<vmem>>, %arg7: memref<1x64xf32, #tpu.memory_space<vmem>>, %arg8: memref<64x64xf32, #tpu.memory_space<vmem>>, %arg9: memref<1x64xf32, #tpu.memory_space<vmem>>, %arg10: memref<64x128xf32, #tpu.memory_space<vmem>>, %arg11: memref<1x128xf32, #tpu.memory_space<vmem>>, %arg12: memref<2x128xf32, #tpu.memory_space<vmem>>, %arg13: memref<8x16xf32, #tpu.memory_space<vmem>>) attributes {dimension_semantics = [#tpu.dimension_semantics<arbitrary>], iteration_bounds = array<i64: 1>, scalar_prefetch = 0 : i64, scratch_operands = 1 : i64, tpu.core_type = #tpu.core_type<tc>, window_params = [{pipeline_mode = #tpu.pipeline_mode<synchronous>, transform_indices = @transform_0, window_bounds = array<i64: 8, 8>}, {pipeline_mode = #tpu.pipeline_mode<synchronous>, transform_indices = @transform_1, window_bounds = array<i64: 1, 16>}, {pipeline_mode = #tpu.pipeline_mode<synchronous>, transform_indices = @transform_2, window_bounds = array<i64: 16, 16>}, {pipeline_mode = #tpu.pipeline_mode<synchronous>, transform_indices = @transform_3, window_bounds = array<i64: 1, 16>}, {pipeline_mode = #tpu.pipeline_mode<synchronous>, transform_indices = @transform_4, window_bounds = array<i64: 1, 16>}, {pipeline_mode = #tpu.pipeline_mode<synchronous>, transform_indices = @transform_5, window_bounds = array<i64: 64, 64>}, {pipeline_mode = #tpu.pipeline_mode<synchronous>, transform_indices = @transform_6, window_bounds = array<i64: 1, 64>}, {pipeline_mode = #tpu.pipeline_mode<synchronous>, transform_indices = @transform_7, window_bounds = array<i64: 64, 64>}, {pipeline_mode = #tpu.pipeline_mode<synchronous>, transform_indices = @transform_8, window_bounds = array<i64: 1, 64>}, {pipeline_mode = #tpu.pipeline_mode<synchronous>, transform_indices = @transform_9, window_bounds = array<i64: 64, 128>}, {pipeline_mode = #tpu.pipeline_mode<synchronous>, transform_indices = @transform_10, window_bounds = array<i64: 1, 128>}, {pipeline_mode = #tpu.pipeline_mode<synchronous>, transform_indices = @transform_11, window_bounds = array<i64: 2, 128>}]} {
    %c0 = arith.constant 0 : index
    %c0_0 = arith.constant 0 : index
    %0 = vector.load %arg3[%c0, %c0_0] : memref<16x16xf32, #tpu.memory_space<vmem>>, vector<16x16xf32>
    %c0_1 = arith.constant 0 : index
    %c0_2 = arith.constant 0 : index
    %1 = vector.load %arg2[%c0_1, %c0_2] : memref<1x16xf32, #tpu.memory_space<vmem>>, vector<1x16xf32>
    %2 = vector.shape_cast %1 : vector<1x16xf32> to vector<1x1x16xf32>
    %c0_3 = arith.constant 0 : index
    %c0_4 = arith.constant 0 : index
    %3 = vector.load %arg4[%c0_3, %c0_4] : memref<1x16xf32, #tpu.memory_space<vmem>>, vector<1x16xf32>
    %c0_5 = arith.constant 0 : index
    %c0_6 = arith.constant 0 : index
    %4 = vector.load %arg5[%c0_5, %c0_6] : memref<1x16xf32, #tpu.memory_space<vmem>>, vector<1x16xf32>
    %5 = arith.addf %3, %4 : vector<1x16xf32>
    %6 = vector.shape_cast %5 : vector<1x16xf32> to vector<1x1x16xf32>
    %c0_7 = arith.constant 0 : index
    %c0_8 = arith.constant 0 : index
    %7 = vector.load %arg1[%c0_7, %c0_8] : memref<8x8xf32, #tpu.memory_space<vmem>>, vector<8x8xf32>
    %8 = vector.shape_cast %7 : vector<8x8xf32> to vector<8x8x1xf32>
    %9 = vector.broadcast %8 : vector<8x8x1xf32> to vector<8x8x16xf32>
    %10 = vector.broadcast %2 : vector<1x1x16xf32> to vector<8x8x16xf32>
    %11 = arith.mulf %9, %10 : vector<8x8x16xf32>
    %12 = vector.broadcast %6 : vector<1x1x16xf32> to vector<8x8x16xf32>
    %13 = arith.addf %11, %12 : vector<8x8x16xf32>
    %14 = vector.extract_strided_slice %13 {offsets = [0, 0, 0], sizes = [1, 8, 16], strides = [1, 1, 1]} : vector<8x8x16xf32> to vector<1x8x16xf32>
    %15 = vector.shape_cast %14 : vector<1x8x16xf32> to vector<8x16xf32>
    %16 = math.tanh %15 : vector<8x16xf32>
    %17 = vector.extract_strided_slice %13 {offsets = [1, 0, 0], sizes = [1, 8, 16], strides = [1, 1, 1]} : vector<8x8x16xf32> to vector<1x8x16xf32>
    %18 = vector.shape_cast %17 : vector<1x8x16xf32> to vector<8x16xf32>
    %cst = arith.constant dense<0.000000e+00> : vector<8x16xf32>
    %19 = tpu.matmul %16, %0, %cst {dimension_numbers = #tpu.dot_dimension_numbers<[1], [0], [0], [1], [0, 0, 1, 1], [], []>} : vector<8x16xf32>, vector<16x16xf32>, vector<8x16xf32> -> vector<8x16xf32>
    %20 = arith.addf %18, %19 : vector<8x16xf32>
    %21 = math.tanh %20 : vector<8x16xf32>
    %22 = vector.extract_strided_slice %13 {offsets = [2, 0, 0], sizes = [1, 8, 16], strides = [1, 1, 1]} : vector<8x8x16xf32> to vector<1x8x16xf32>
    %23 = vector.shape_cast %22 : vector<1x8x16xf32> to vector<8x16xf32>
    %cst_9 = arith.constant dense<0.000000e+00> : vector<8x16xf32>
    %24 = tpu.matmul %21, %0, %cst_9 {dimension_numbers = #tpu.dot_dimension_numbers<[1], [0], [0], [1], [0, 0, 1, 1], [], []>} : vector<8x16xf32>, vector<16x16xf32>, vector<8x16xf32> -> vector<8x16xf32>
    %25 = arith.addf %23, %24 : vector<8x16xf32>
    %26 = math.tanh %25 : vector<8x16xf32>
    %27 = vector.extract_strided_slice %13 {offsets = [3, 0, 0], sizes = [1, 8, 16], strides = [1, 1, 1]} : vector<8x8x16xf32> to vector<1x8x16xf32>
    %28 = vector.shape_cast %27 : vector<1x8x16xf32> to vector<8x16xf32>
    %cst_10 = arith.constant dense<0.000000e+00> : vector<8x16xf32>
    %29 = tpu.matmul %26, %0, %cst_10 {dimension_numbers = #tpu.dot_dimension_numbers<[1], [0], [0], [1], [0, 0, 1, 1], [], []>} : vector<8x16xf32>, vector<16x16xf32>, vector<8x16xf32> -> vector<8x16xf32>
    %30 = arith.addf %28, %29 : vector<8x16xf32>
    %31 = math.tanh %30 : vector<8x16xf32>
    %32 = vector.extract_strided_slice %13 {offsets = [4, 0, 0], sizes = [1, 8, 16], strides = [1, 1, 1]} : vector<8x8x16xf32> to vector<1x8x16xf32>
    %33 = vector.shape_cast %32 : vector<1x8x16xf32> to vector<8x16xf32>
    %cst_11 = arith.constant dense<0.000000e+00> : vector<8x16xf32>
    %34 = tpu.matmul %31, %0, %cst_11 {dimension_numbers = #tpu.dot_dimension_numbers<[1], [0], [0], [1], [0, 0, 1, 1], [], []>} : vector<8x16xf32>, vector<16x16xf32>, vector<8x16xf32> -> vector<8x16xf32>
    %35 = arith.addf %33, %34 : vector<8x16xf32>
    %36 = math.tanh %35 : vector<8x16xf32>
    %37 = vector.extract_strided_slice %13 {offsets = [5, 0, 0], sizes = [1, 8, 16], strides = [1, 1, 1]} : vector<8x8x16xf32> to vector<1x8x16xf32>
    %38 = vector.shape_cast %37 : vector<1x8x16xf32> to vector<8x16xf32>
    %cst_12 = arith.constant dense<0.000000e+00> : vector<8x16xf32>
    %39 = tpu.matmul %36, %0, %cst_12 {dimension_numbers = #tpu.dot_dimension_numbers<[1], [0], [0], [1], [0, 0, 1, 1], [], []>} : vector<8x16xf32>, vector<16x16xf32>, vector<8x16xf32> -> vector<8x16xf32>
    %40 = arith.addf %38, %39 : vector<8x16xf32>
    %41 = math.tanh %40 : vector<8x16xf32>
    %42 = vector.extract_strided_slice %13 {offsets = [6, 0, 0], sizes = [1, 8, 16], strides = [1, 1, 1]} : vector<8x8x16xf32> to vector<1x8x16xf32>
    %43 = vector.shape_cast %42 : vector<1x8x16xf32> to vector<8x16xf32>
    %cst_13 = arith.constant dense<0.000000e+00> : vector<8x16xf32>
    %44 = tpu.matmul %41, %0, %cst_13 {dimension_numbers = #tpu.dot_dimension_numbers<[1], [0], [0], [1], [0, 0, 1, 1], [], []>} : vector<8x16xf32>, vector<16x16xf32>, vector<8x16xf32> -> vector<8x16xf32>
    %45 = arith.addf %43, %44 : vector<8x16xf32>
    %46 = math.tanh %45 : vector<8x16xf32>
    %47 = vector.extract_strided_slice %13 {offsets = [7, 0, 0], sizes = [1, 8, 16], strides = [1, 1, 1]} : vector<8x8x16xf32> to vector<1x8x16xf32>
    %48 = vector.shape_cast %47 : vector<1x8x16xf32> to vector<8x16xf32>
    %cst_14 = arith.constant dense<0.000000e+00> : vector<8x16xf32>
    %49 = tpu.matmul %46, %0, %cst_14 {dimension_numbers = #tpu.dot_dimension_numbers<[1], [0], [0], [1], [0, 0, 1, 1], [], []>} : vector<8x16xf32>, vector<16x16xf32>, vector<8x16xf32> -> vector<8x16xf32>
    %50 = arith.addf %48, %49 : vector<8x16xf32>
    %51 = math.tanh %50 : vector<8x16xf32>
    %c0_15 = arith.constant 0 : index
    %c0_16 = arith.constant 0 : index
    %52 = vector.load %arg13[%c0_15, %c0_16] : memref<8x16xf32, #tpu.memory_space<vmem>>, vector<8x16xf32>
    tpu.vector_store %arg13[%c0_15, %c0_16], %51 {strides = array<i32>} : memref<8x16xf32, #tpu.memory_space<vmem>>, vector<8x16xf32>,
    %cst_17 = arith.constant 0.000000e+00 : f32
    %53 = vector.broadcast %cst_17 : f32 to vector<2x64xf32>
    %c0_18 = arith.constant 0 : index
    %c0_19 = arith.constant 0 : index
    %54 = vector.load %arg13[%c0_18, %c0_19] : memref<8x16xf32, #tpu.memory_space<vmem>>, vector<2x16xf32>
    %c0_20 = arith.constant 0 : index
    %c0_21 = arith.constant 0 : index
    %55 = vector.load %arg6[%c0_20, %c0_21] : memref<64x64xf32, #tpu.memory_space<vmem>>, vector<16x64xf32>
    %cst_22 = arith.constant dense<0.000000e+00> : vector<2x64xf32>
    %56 = tpu.matmul %54, %55, %cst_22 {dimension_numbers = #tpu.dot_dimension_numbers<[1], [0], [0], [1], [0, 0, 1, 1], [], []>} : vector<2x16xf32>, vector<16x64xf32>, vector<2x64xf32> -> vector<2x64xf32>
    %57 = arith.addf %53, %56 : vector<2x64xf32>
    %c2 = arith.constant 2 : index
    %c0_23 = arith.constant 0 : index
    %58 = vector.load %arg13[%c2, %c0_23] : memref<8x16xf32, #tpu.memory_space<vmem>>, vector<2x16xf32>
    %c16 = arith.constant 16 : index
    %c0_24 = arith.constant 0 : index
    %59 = vector.load %arg6[%c16, %c0_24] : memref<64x64xf32, #tpu.memory_space<vmem>>, vector<16x64xf32>
    %cst_25 = arith.constant dense<0.000000e+00> : vector<2x64xf32>
    %60 = tpu.matmul %58, %59, %cst_25 {dimension_numbers = #tpu.dot_dimension_numbers<[1], [0], [0], [1], [0, 0, 1, 1], [], []>} : vector<2x16xf32>, vector<16x64xf32>, vector<2x64xf32> -> vector<2x64xf32>
    %61 = arith.addf %57, %60 : vector<2x64xf32>
    %c4 = arith.constant 4 : index
    %c0_26 = arith.constant 0 : index
    %62 = vector.load %arg13[%c4, %c0_26] : memref<8x16xf32, #tpu.memory_space<vmem>>, vector<2x16xf32>
    %c32 = arith.constant 32 : index
    %c0_27 = arith.constant 0 : index
    %63 = vector.load %arg6[%c32, %c0_27] : memref<64x64xf32, #tpu.memory_space<vmem>>, vector<16x64xf32>
    %cst_28 = arith.constant dense<0.000000e+00> : vector<2x64xf32>
    %64 = tpu.matmul %62, %63, %cst_28 {dimension_numbers = #tpu.dot_dimension_numbers<[1], [0], [0], [1], [0, 0, 1, 1], [], []>} : vector<2x16xf32>, vector<16x64xf32>, vector<2x64xf32> -> vector<2x64xf32>
    %65 = arith.addf %61, %64 : vector<2x64xf32>
    %c6 = arith.constant 6 : index
    %c0_29 = arith.constant 0 : index
    %66 = vector.load %arg13[%c6, %c0_29] : memref<8x16xf32, #tpu.memory_space<vmem>>, vector<2x16xf32>
    %c48 = arith.constant 48 : index
    %c0_30 = arith.constant 0 : index
    %67 = vector.load %arg6[%c48, %c0_30] : memref<64x64xf32, #tpu.memory_space<vmem>>, vector<16x64xf32>
    %cst_31 = arith.constant dense<0.000000e+00> : vector<2x64xf32>
    %68 = tpu.matmul %66, %67, %cst_31 {dimension_numbers = #tpu.dot_dimension_numbers<[1], [0], [0], [1], [0, 0, 1, 1], [], []>} : vector<2x16xf32>, vector<16x64xf32>, vector<2x64xf32> -> vector<2x64xf32>
    %69 = arith.addf %65, %68 : vector<2x64xf32>
    %c0_32 = arith.constant 0 : index
    %c0_33 = arith.constant 0 : index
    %70 = vector.load %arg7[%c0_32, %c0_33] : memref<1x64xf32, #tpu.memory_space<vmem>>, vector<1x64xf32>
    %71 = vector.broadcast %70 : vector<1x64xf32> to vector<2x64xf32>
    %72 = arith.addf %69, %71 : vector<2x64xf32>
    %cst_34 = arith.constant 0.000000e+00 : f32
    %73 = vector.broadcast %cst_34 : f32 to vector<2x64xf32>
    %74 = arith.maximumf %72, %73 : vector<2x64xf32>
    %c0_35 = arith.constant 0 : index
    %c0_36 = arith.constant 0 : index
    %75 = vector.load %arg8[%c0_35, %c0_36] : memref<64x64xf32, #tpu.memory_space<vmem>>, vector<64x64xf32>
    %cst_37 = arith.constant dense<0.000000e+00> : vector<2x64xf32>
    %76 = tpu.matmul %74, %75, %cst_37 {dimension_numbers = #tpu.dot_dimension_numbers<[1], [0], [0], [1], [0, 0, 1, 1], [], []>} : vector<2x64xf32>, vector<64x64xf32>, vector<2x64xf32> -> vector<2x64xf32>
    %c0_38 = arith.constant 0 : index
    %c0_39 = arith.constant 0 : index
    %77 = vector.load %arg9[%c0_38, %c0_39] : memref<1x64xf32, #tpu.memory_space<vmem>>, vector<1x64xf32>
    %78 = vector.broadcast %77 : vector<1x64xf32> to vector<2x64xf32>
    %79 = arith.addf %76, %78 : vector<2x64xf32>
    %cst_40 = arith.constant 0.000000e+00 : f32
    %80 = vector.broadcast %cst_40 : f32 to vector<2x64xf32>
    %81 = arith.maximumf %79, %80 : vector<2x64xf32>
    %c0_41 = arith.constant 0 : index
    %c0_42 = arith.constant 0 : index
    %82 = vector.load %arg10[%c0_41, %c0_42] : memref<64x128xf32, #tpu.memory_space<vmem>>, vector<64x128xf32>
    %cst_43 = arith.constant dense<0.000000e+00> : vector<2x128xf32>
    %83 = tpu.matmul %81, %82, %cst_43 {dimension_numbers = #tpu.dot_dimension_numbers<[1], [0], [0], [1], [0, 0, 1, 1], [], []>} : vector<2x64xf32>, vector<64x128xf32>, vector<2x128xf32> -> vector<2x128xf32>
    %c0_44 = arith.constant 0 : index
    %c0_45 = arith.constant 0 : index
    %84 = vector.load %arg11[%c0_44, %c0_45] : memref<1x128xf32, #tpu.memory_space<vmem>>, vector<1x128xf32>
    %85 = vector.broadcast %84 : vector<1x128xf32> to vector<2x128xf32>
    %86 = arith.addf %83, %85 : vector<2x128xf32>
    %c0_46 = arith.constant 0 : index
    %c0_47 = arith.constant 0 : index
    %87 = vector.load %arg12[%c0_46, %c0_47] : memref<2x128xf32, #tpu.memory_space<vmem>>, vector<2x128xf32>
    tpu.vector_store %arg12[%c0_46, %c0_47], %86 {strides = array<i32>} : memref<2x128xf32, #tpu.memory_space<vmem>>, vector<2x128xf32>,
    return
  }
  func.func @transform_0(%arg0: i32) -> (i32, i32) {
    %c0_i32 = arith.constant 0 : i32
    %c0_i32_0 = arith.constant 0 : i32
    %c0_i32_1 = arith.constant 0 : i32
    return %c0_i32, %c0_i32_0 : i32, i32
  }
  func.func @transform_1(%arg0: i32) -> (i32, i32) {
    %c0_i32 = arith.constant 0 : i32
    %c0_i32_0 = arith.constant 0 : i32
    %c0_i32_1 = arith.constant 0 : i32
    return %c0_i32, %c0_i32_0 : i32, i32
  }
  func.func @transform_2(%arg0: i32) -> (i32, i32) {
    %c0_i32 = arith.constant 0 : i32
    %c0_i32_0 = arith.constant 0 : i32
    %c0_i32_1 = arith.constant 0 : i32
    return %c0_i32, %c0_i32_0 : i32, i32
  }
  func.func @transform_3(%arg0: i32) -> (i32, i32) {
    %c0_i32 = arith.constant 0 : i32
    %c0_i32_0 = arith.constant 0 : i32
    %c0_i32_1 = arith.constant 0 : i32
    return %c0_i32, %c0_i32_0 : i32, i32
  }
  func.func @transform_4(%arg0: i32) -> (i32, i32) {
    %c0_i32 = arith.constant 0 : i32
    %c0_i32_0 = arith.constant 0 : i32
    %c0_i32_1 = arith.constant 0 : i32
    return %c0_i32, %c0_i32_0 : i32, i32
  }
  func.func @transform_5(%arg0: i32) -> (i32, i32) {
    %c0_i32 = arith.constant 0 : i32
    %c0_i32_0 = arith.constant 0 : i32
    %c0_i32_1 = arith.constant 0 : i32
    return %c0_i32, %c0_i32_0 : i32, i32
  }
  func.func @transform_6(%arg0: i32) -> (i32, i32) {
    %c0_i32 = arith.constant 0 : i32
    %c0_i32_0 = arith.constant 0 : i32
    %c0_i32_1 = arith.constant 0 : i32
    return %c0_i32, %c0_i32_0 : i32, i32
  }
  func.func @transform_7(%arg0: i32) -> (i32, i32) {
    %c0_i32 = arith.constant 0 : i32
    %c0_i32_0 = arith.constant 0 : i32
    %c0_i32_1 = arith.constant 0 : i32
    return %c0_i32, %c0_i32_0 : i32, i32
  }
  func.func @transform_8(%arg0: i32) -> (i32, i32) {
    %c0_i32 = arith.constant 0 : i32
    %c0_i32_0 = arith.constant 0 : i32
    %c0_i32_1 = arith.constant 0 : i32
    return %c0_i32, %c0_i32_0 : i32, i32
  }
  func.func @transform_9(%arg0: i32) -> (i32, i32) {
    %c0_i32 = arith.constant 0 : i32
    %c0_i32_0 = arith.constant 0 : i32
    %c0_i32_1 = arith.constant 0 : i32
    return %c0_i32, %c0_i32_0 : i32, i32
  }
  func.func @transform_10(%arg0: i32) -> (i32, i32) {
    %c0_i32 = arith.constant 0 : i32
    %c0_i32_0 = arith.constant 0 : i32
    %c0_i32_1 = arith.constant 0 : i32
    return %c0_i32, %c0_i32_0 : i32, i32
  }
  func.func @transform_11(%arg0: i32) -> (i32, i32) {
    %c0_i32 = arith.constant 0 : i32
    %c0_i32_0 = arith.constant 0 : i32
    %c0_i32_1 = arith.constant 0 : i32
    return %c0_i32, %c0_i32_0 : i32, i32
  }
}

</mosaic_0001>

<bundles_post_ra>
// kernel: tpu_custom_call.1
= control target key start
LH: loop header
LB: loop body
LE: loop exit
PB: predicated region body
PF: predicated region fallthrough
CT: control target
= control target key end

     0   :  { %16 = vsyncpa [#allocation4], 0  ;;  %s1921_s0 = inlined_call_operand.hbm [shape: f32[8,8], index: 0, kind: input, shape index: {}]   ;;  %s1922_s1 = inlined_call_operand.vmem [shape: f32[1,16], index: 1, kind: input, shape index: {}]   ;;  %s1923_s2 = inlined_call_operand.hbm [shape: f32[16,16], index: 2, kind: input, shape index: {}]   ;;  %s1924_s3 = inlined_call_operand.vmem [shape: f32[1,16], index: 3, kind: input, shape index: {}]   ;;  %s1925_s4 = inlined_call_operand.vmem [shape: f32[1,16], index: 4, kind: input, shape index: {}]   ;;  %s1926_s5 = inlined_call_operand.hbm [shape: f32[64,64], index: 5, kind: input, shape index: {}]   ;;  %s1927_s6 = inlined_call_operand.vmem [shape: f32[1,64], index: 6, kind: input, shape index: {}]   ;;  %s1928_s7 = inlined_call_operand.hbm [shape: f32[64,64], index: 7, kind: input, shape index: {}]   ;;  %s1929_s8 = inlined_call_operand.vmem [shape: f32[1,64], index: 8, kind: input, shape index: {}]   ;;  %s1930_s9 = inlined_call_operand.hbm [shape: f32[64,128], index: 9, kind: input, shape index: {}]   ;;  %s1931_s10 = inlined_call_operand.vmem [shape: f32[1,128], index: 10, kind: input, shape index: {}]   ;;  %s1932_s11 = inlined_call_operand.hbm [shape: f32[2,128], index: 11, kind: output, shape index: {}]  }
   0x1   :  { %17 = vsyncpa [#allocation7], 0 }
   0x2   :  { %18 = vsyncpa [#allocation10], 0 }
   0x3   :  { %19 = vsyncpa [#allocation5], 0  ;;  %s1642_s17 = smov [#allocation6]   ;;  %s1502_s21 = scalar_lea.hbm %s1923_s2, 256 }
   0x4   :  { %s37_s18 = sshll.u32 %s1642_s17, 4  ;;  %p1503_p0 = scmp.ne.s32.totalorder %s1923_s2, %s1502_s21  ;;  %s38_s18 = int_to_ptr.vmem [resolvable:$true] %s37_s18 }
   0x5   :  { %p1506_p1 = scmp.lt.u32.totalorder %s1502_s21, %s1923_s2 }
   0x7   :  { %p1508_p2 = pnand %p1506_p1, %p1503_p0 }
   0x9   :  { %1511 = shalt.err (!%p1508_p2)
}
   0xa   :  { %s1512_s26 = scalar_lea.vmem %s38_s18, 256  ;;  %p1517_p4 = scmp.lt.s32.totalorder %s38_s18, %s38_s18 }
   0xb   :  { %p1513_p3 = scmp.ne.s32.totalorder %s38_s18, %s1512_s26  ;;  %p1518_p5 = scmp.lt.s32.totalorder %s1512_s26, %s1512_s26 }
   0xd   :  { %p1519_p6 = por %p1518_p5, %p1517_p4 }
   0xf   :  { %p1520_p7 = pnand %p1519_p6, %p1513_p3 }
  0x11   :  { %1523 = shalt.err (!%p1520_p7)
}
  0x12   :  { %s1643_s27 = smov 128   ;;  %s1644_s28 = smov 8  }
  0x13   :  { %43 = dma.hbm_to_vmem [thread:$0]  %s1923_s2, 256, %s38_s18, [#allocation7], %s1643_s27, %s1643_s27, %s1644_s28  }
  0x14   :  { %s1645_s12 = smov [#allocation9]   ;;  %s1646_s14 = smov [#allocation3]  }
  0x15   :  { %s67_s13 = sshll.u32 %s1645_s12, 4  ;;  %s26_s15 = sshll.u32 %s1646_s14, 4  ;;  %s68_s13 = int_to_ptr.vmem [resolvable:$true] %s67_s13  ;;  %s27_s15 = int_to_ptr.vmem [resolvable:$true] %s26_s15 }
  0x16   :  { %s1524_s19 = scalar_lea.hbm %s1928_s7, 1024 }
  0x17   :  { %p1525_p8 = scmp.ne.s32.totalorder %s1928_s7, %s1524_s19  ;;  %p1528_p9 = scmp.lt.u32.totalorder %s1524_s19, %s1928_s7 }
  0x19   :  { %p1530_p10 = pnand %p1528_p9, %p1525_p8 }
  0x1b   :  { %1533 = shalt.err (!%p1530_p10)
}
  0x1c   :  { %s1534_s2 = scalar_lea.vmem %s68_s13, 1024  ;;  %p1539_p12 = scmp.lt.s32.totalorder %s68_s13, %s68_s13 }
  0x1d   :  { %p1535_p11 = scmp.ne.s32.totalorder %s68_s13, %s1534_s2  ;;  %p1540_p13 = scmp.lt.s32.totalorder %s1534_s2, %s1534_s2 }
  0x1f   :  { %p1541_p0 = por %p1540_p13, %p1539_p12 }
  0x21   :  { %p1542_p1 = pnand %p1541_p0, %p1535_p11 }
  0x23   :  { %1545 = shalt.err (!%p1542_p1)
}
  0x24   :  { %73 = dma.hbm_to_vmem [thread:$0]  %s1928_s7, 1024, %s68_s13, [#allocation10], %s1643_s27, %s1643_s27, %s1644_s28  }
  0x25   :  { %s1546_s29 = scalar_lea.hbm %s1921_s0, 128 }
  0x26   :  { %p1547_p2 = scmp.ne.s32.totalorder %s1921_s0, %s1546_s29  ;;  %p1550_p3 = scmp.lt.u32.totalorder %s1546_s29, %s1921_s0 }
  0x28   :  { %p1552_p4 = pnand %p1550_p3, %p1547_p2 }
  0x2a   :  { %1555 = shalt.err (!%p1552_p4)
}
  0x2b   :  { %s1556_s17 = scalar_lea.vmem %s27_s15, 128  ;;  %p1561_p6 = scmp.lt.s32.totalorder %s27_s15, %s27_s15 }
  0x2c   :  { %p1557_p5 = scmp.ne.s32.totalorder %s27_s15, %s1556_s17  ;;  %p1562_p7 = scmp.lt.s32.totalorder %s1556_s17, %s1556_s17 }
  0x2e   :  { %p1563_p8 = por %p1562_p7, %p1561_p6 }
  0x30   :  { %p1564_p9 = pnand %p1563_p8, %p1557_p5 }
  0x32   :  { %1567 = shalt.err (!%p1564_p9)
}
  0x33   :  { %29 = dma.hbm_to_vmem [thread:$0]  %s1921_s0, 128, %s27_s15, [#allocation4]  }
  0x34   :  { %s1647_s19 = smov [#allocation8]   ;;  %s1648_s21 = smov [#allocation11]  }
  0x35   :  { %s53_s20 = sshll.u32 %s1647_s19, 4  ;;  %s81_s22 = sshll.u32 %s1648_s21, 4  ;;  %s54_s20 = int_to_ptr.vmem [resolvable:$true] %s53_s20  ;;  %s82_s22 = int_to_ptr.vmem [resolvable:$true] %s81_s22 }
  0x36   :  { %s1568_s18 = scalar_lea.hbm %s1926_s5, 1024 }
  0x37   :  { %p1569_p10 = scmp.ne.s32.totalorder %s1926_s5, %s1568_s18  ;;  %p1572_p11 = scmp.lt.u32.totalorder %s1568_s18, %s1926_s5 }
  0x39   :  { %p1574_p12 = pnand %p1572_p11, %p1569_p10 }
  0x3b   :  { %1577 = shalt.err (!%p1574_p12)
}
  0x3c   :  { %s1578_s0 = scalar_lea.vmem %s54_s20, 1024  ;;  %p1583_p0 = scmp.lt.s32.totalorder %s54_s20, %s54_s20 }
  0x3d   :  { %p1579_p13 = scmp.ne.s32.totalorder %s54_s20, %s1578_s0  ;;  %p1584_p1 = scmp.lt.s32.totalorder %s1578_s0, %s1578_s0 }
  0x3f   :  { %p1585_p2 = por %p1584_p1, %p1583_p0 }
  0x41   :  { %p1586_p3 = pnand %p1585_p2, %p1579_p13 }
  0x43   :  { %1589 = shalt.err (!%p1586_p3)
}
  0x44   :  { %59 = dma.hbm_to_vmem [thread:$0]  %s1926_s5, 1024, %s54_s20, [#allocation7], %s1643_s27, %s1643_s27, %s1644_s28  }
  0x45   :  { %s1590_s16 = scalar_lea.hbm %s1930_s9, 1024 }
  0x46   :  { %p1591_p4 = scmp.ne.s32.totalorder %s1930_s9, %s1590_s16  ;;  %p1594_p5 = scmp.lt.u32.totalorder %s1590_s16, %s1930_s9 }
  0x48   :  { %p1596_p6 = pnand %p1594_p5, %p1591_p4 }
  0x4a   :  { %1599 = shalt.err (!%p1596_p6)
}
  0x4b   :  { %s1600_s21 = scalar_lea.vmem %s82_s22, 1024  ;;  %p1605_p8 = scmp.lt.s32.totalorder %s82_s22, %s82_s22 }
  0x4c   :  { %p1601_p7 = scmp.ne.s32.totalorder %s82_s22, %s1600_s21  ;;  %p1606_p9 = scmp.lt.s32.totalorder %s1600_s21, %s1600_s21 }
  0x4e   :  { %p1607_p10 = por %p1606_p9, %p1605_p8 }
  0x50   :  { %p1608_p11 = pnand %p1607_p10, %p1601_p7 }
  0x52   :  { %1611 = shalt.err (!%p1608_p11)
}
  0x53   :  { %87 = dma.hbm_to_vmem [thread:$0]  %s1930_s9, 1024, %s82_s22, [#allocation10], %s1643_s27, %s1643_s27, %s1644_s28  }
  0x54   :  { %1634 = dma.done.wait [#allocation4], 128  }
  0x55   :  { %1635 = vsyncadd [#allocation4], 4294967168 }
  0x56   :  { %1636 = dma.done.wait [#allocation7], 1280  }
  0x57   :  { %1637 = vsyncadd [#allocation7], 4294966016 }
  0x58   :  { %1638 = dma.done.wait [#allocation10], 2048  }
  0x59   :  { %1639 = vsyncadd [#allocation10], 4294965248  ;;  %v112_v0 = vlaneseq  ;;  %v1649_v2 = vmov 0.0|0.0   ;;  %vm1650_vm0 = vmmov 0   ;;  %v1651_v3 = vmov 0.0   ;;  %v1794_v5 = vld [vmem:[#allocation3] sm:$0xff] }
  0x5a   :  { %1418 = vmatprep.subr.bf16.mxu0 %v1649_v2  ;;  %1307 = vmatprep.mubr.msk.f32.mxu0 %vm1650_vm0, %v1651_v3  ;;  %v105_v7 = vld [vmem:[#allocation6] sm:$0xff]  ;;  %v106_v8 = vld [vmem:[#allocation6 + $0x8] sm:$0xff]  ;;  %v108_v12 = vld [vmem:[%s1924_s3] sm:$0x1]  ;;  %vm197_vm1 = vcmask 130048   ;;  %vm1054_vm2 = vcmask 523264  }
  0x5b   :  { %v1785_v1 = vshrl.u32 %v112_v0, 7  ;;  %1421 = vmatprep.subr.bf16.mxu1 %v1649_v2  ;;  %1314 = vmatprep.mubr.msk.f32.mxu1 %vm1650_vm0, %v1651_v3  ;;  %v1797_v9 = vpack.c.bf16 %v106_v8, %v105_v7  ;;  %v109_v13 = vld [vmem:[%s1925_s4] sm:$0x1]  ;;  %s1652_s25 = smov [#allocation12]  }
  0x5c   :  { %v110_v14 = vadd.f32 %v109_v13, %v108_v12  ;;  %v1814_v15 = vld [vmem:[%s1922_s1] ss:$0 sm:$0xff]  ;;  %s1224_s26 = sshll.u32 %s1652_s25, 4  ;;  %s1225_s26 = int_to_ptr.vmem [resolvable:$true] %s1224_s26 }
  0x5d   :  { %v114_v4 = vsub.s32 0, %v1785_v1  ;;  %1420 = vmatpush3.bf16.msra.mxu0 %v1797_v9  ;;  %1423 = vmatpush3.bf16.msra.mxu1 %v1797_v9  ;;  %v121_v10 = vsub.s32 1, %v1785_v1  ;;  %v128_v21 = vsub.s32 2, %v1785_v1  ;;  %v135_v30 = vsub.s32 3, %v1785_v1  ;;  %s1612_s29 = scalar_lea.vmem %s1225_s26, 32  ;;  %p1617_p13 = scmp.lt.s32.totalorder %s1225_s26, %s1225_s26 }
  0x5e   :  { %1424 = vmatprep.subr.bf16.mxu0 %v1649_v2  ;;  %1427 = vmatprep.subr.bf16.mxu1 %v1649_v2  ;;  %v142_v39 = vsub.s32 4, %v1785_v1  ;;  %v149_v48 = vsub.s32 5, %v1785_v1  ;;  %v156_v57 = vsub.s32 6, %v1785_v1  ;;  %p1613_p12 = scmp.ne.s32.totalorder %s1225_s26, %s1612_s29  ;;  %p1618_p0 = scmp.lt.s32.totalorder %s1612_s29, %s1612_s29 }
  0x5f   :  { %v115_v6 = vrot.slane %v1794_v5, %v114_v4  ;;  %v122_v11 = vrot.slane %v1794_v5, %v121_v10  ;;  %v1816_v16 = vrot.slane %v110_v14, %v114_v4  ;;  %v129_v22 = vrot.slane %v1794_v5, %v128_v21 }
  0x60   :  { %v136_v31 = vrot.slane %v1794_v5, %v135_v30  ;;  %v143_v40 = vrot.slane %v1794_v5, %v142_v39  ;;  %v150_v49 = vrot.slane %v1794_v5, %v149_v48  ;;  %v157_v58 = vrot.slane %v1794_v5, %v156_v57  ;;  %v954_v30 = vld [vmem:[#allocation8 + $0x30] sm:$0xff]  ;;  %v1129_v48 = vld [vmem:[#allocation11] sm:$0xff]  ;;  %p1619_p1 = por %p1618_p0, %p1617_p13 }
  0x61   :  { %117 = vbcast.lane.b32.xlu0 %v115_v6, 256  ;;  %131 = vbcast.lane.b32.xlu1 %v129_v22, 256  ;;  %v163_v6 = vsub.s32 7, %v1785_v1  ;;  %v729_v1 = vld [vmem:[#allocation8 + $0x18] sm:$0xff]  ;;  %v1041_v39 = vld [vmem:[#allocation9 + $0x10] sm:$0xff] }
  0x62   :  { %p1620_p2 = pnand %p1619_p1, %p1613_p12 }
  0x63   :  { %v164_v7 = vrot.slane %v1794_v5, %v163_v6  ;;  %v1247_v6 = vld [vmem:[%s1927_s6] ss:$0 sm:$0xff] }
  0x65   :  { %124 = vbcast.lane.b32.xlu0 %v122_v11, 256  ;;  %138 = vbcast.lane.b32.xlu1 %v136_v31, 256  ;;  %v955_v31 = vld [vmem:[#allocation8 + $0x38] sm:$0xff] }
  0x69   :  { %145 = vbcast.lane.b32.xlu0 %v143_v40, 256  ;;  %152 = vbcast.lane.b32.xlu1 %v150_v49, 256  ;;  %v1042_v40 = vld [vmem:[#allocation9 + $0x18] sm:$0xff]  ;;  %v1130_v49 = vld [vmem:[#allocation11 + $0x8] sm:$0xff] }
  0x6d   :  { %159 = vbcast.lane.b32.xlu0 %v157_v58, 256  ;;  %166 = vbcast.lane.b32.xlu1 %v164_v7, 256 }
  0xd3   :  { %v118_v17 = vpop.permute.xlu0 %117  ;;  %v132_v32 = vpop.permute.xlu1 %131 }
  0xd4   :  { %v174_v18 = vmul.f32 %v1814_v15, %v118_v17  ;;  %v176_v33 = vmul.f32 %v1814_v15, %v132_v32  ;;  %v728_v17 = vld [vmem:[#allocation8 + $0x10] sm:$0xff] }
  0xd5   :  { %v1440_v5 = vpack.c.bf16 %v729_v1, %v728_v17 }
  0xd6   :  { %v188_v19 = vadd.f32 %v1816_v16, %v174_v18  ;;  %v190_v34 = vadd.f32 %v1816_v16, %v176_v33  ;;  %v725_v18 = vld [vmem:[#allocation8] sm:$0xff]  ;;  %v1449_v33 = vpack.c.bf16 %v955_v31, %v954_v30 }
  0xd7   :  { %v125_v23 = vpop.permute.xlu0 %124  ;;  %v139_v41 = vpop.permute.xlu1 %138 }
  0xd8   :  { %1486 = vtanh.f32 %v188_v19  ;;  %v175_v24 = vmul.f32 %v1814_v15, %v125_v23  ;;  %v177_v42 = vmul.f32 %v1814_v15, %v139_v41  ;;  %v726_v19 = vld [vmem:[#allocation8 + $0x8] sm:$0xff]  ;;  %v1455_v41 = vpack.c.bf16 %v1042_v40, %v1041_v39 }
  0xda   :  { %v189_v25 = vadd.f32 %v1816_v16, %v175_v24  ;;  %v191_v43 = vadd.f32 %v1816_v16, %v177_v42  ;;  %v1043_v42 = vld [vmem:[#allocation9 + $0x20] sm:$0xff] }
  0xdb   :  { %v146_v50 = vpop.permute.xlu0 %145  ;;  %v153_v59 = vpop.permute.xlu1 %152 }
  0xdc   :  { %v178_v51 = vmul.f32 %v1814_v15, %v146_v50  ;;  %v179_v60 = vmul.f32 %v1814_v15, %v153_v59  ;;  %v1131_v50 = vld [vmem:[#allocation11 + $0x10] sm:$0xff] }
  0xde   :  { %v192_v52 = vadd.f32 %v1816_v16, %v178_v51  ;;  %v193_v61 = vadd.f32 %v1816_v16, %v179_v60  ;;  %v1132_v51 = vld [vmem:[#allocation11 + $0x18] sm:$0xff] }
  0xdf   :  { %v160_v8 = vpop.permute.xlu0 %159  ;;  %v167_v21 = vpop.permute.xlu1 %166 }
  0xe0   :  { %v181_v22 = vmul.f32 %v1814_v15, %v167_v21 }
  0xe2   :  { %v1487_v20 = vpop.eup %1486  ;;  %v195_v23 = vadd.f32 %v1816_v16, %v181_v22 }
  0xe3   :  { %1308 = vmatmul.mubr.msk.f32.vlgmr.msra.gmra.mrb[0].mxu0 %vm197_vm1, %v1487_v20  ;;  %v1443_v20 = vpack.c.bf16 %v726_v19, %v725_v18  ;;  %v1250_v18 = vld [vmem:[%s1931_s10] ss:$0 sm:$0xff] }
  0xe4   :  { %1426 = vmatpush3.bf16.msra.mxu0 %v1797_v9  ;;  %1321 = vmatprep.mubr.msk.f32.mxu0 %vm1650_vm0, %v1651_v3 }
  0xe5   :  { %1430 = vmatprep.subr.bf16.mxu0 %v1649_v2 }
 0x1b6   :  { %v267_v26 = vpop.f32.mrb[0].mxu0 }
 0x1b7   :  { %v271_v27 = vadd.f32 %v267_v26, %v189_v25  ;;  %v1309_v28 = vpop.f32.mrb[1].mxu0 }
 0x1b8   :  { %v877_v28 = vld [vmem:[#allocation8 + $0x20] sm:$0xff] }
 0x1b9   :  { %1488 = vtanh.f32 %v271_v27 }
 0x1c3   :  { %v1489_v29 = vpop.eup %1488 }
 0x1c4   :  { %1315 = vmatmul.mubr.msk.f32.vlgmr.msra.gmra.mrb[0].mxu1 %vm197_vm1, %v1489_v29  ;;  %v878_v29 = vld [vmem:[#allocation8 + $0x28] sm:$0xff] }
 0x1c5   :  { %1429 = vmatpush3.bf16.msra.mxu1 %v1797_v9  ;;  %1328 = vmatprep.mubr.msk.f32.mxu1 %vm1650_vm0, %v1651_v3  ;;  %v1446_v32 = vpack.c.bf16 %v878_v29, %v877_v28 }
 0x1c6   :  { %1433 = vmatprep.subr.bf16.mxu1 %v1649_v2 }
 0x297   :  { %v342_v35 = vpop.f32.mrb[0].mxu1 }
 0x298   :  { %v346_v36 = vadd.f32 %v342_v35, %v190_v34  ;;  %v1316_v37 = vpop.f32.mrb[1].mxu1  ;;  %v1039_v34 = vld [vmem:[#allocation9] sm:$0xff]  ;;  %v1040_v35 = vld [vmem:[#allocation9 + $0x8] sm:$0xff] }
 0x29a   :  { %1490 = vtanh.f32 %v346_v36 }
 0x2a4   :  { %v1491_v38 = vpop.eup %1490 }
 0x2a5   :  { %1322 = vmatmul.mubr.msk.f32.vlgmr.msra.gmra.mrb[2].mxu0 %vm197_vm1, %v1491_v38 }
 0x2a6   :  { %1432 = vmatpush3.bf16.msra.mxu0 %v1797_v9  ;;  %1335 = vmatprep.mubr.msk.f32.mxu0 %vm1650_vm0, %v1651_v3 }
 0x2a7   :  { %1436 = vmatprep.subr.bf16.mxu0 %v1649_v2 }
 0x378   :  { %v417_v44 = vpop.f32.mrb[2].mxu0 }
 0x379   :  { %v421_v45 = vadd.f32 %v417_v44, %v191_v43  ;;  %v1323_v46 = vpop.f32.mrb[3].mxu0  ;;  %v1044_v43 = vld [vmem:[#allocation9 + $0x28] sm:$0xff] }
 0x37a   :  { %v1458_v44 = vpack.c.bf16 %v1044_v43, %v1043_v42  ;;  %v1046_v46 = vld [vmem:[#allocation9 + $0x38] sm:$0xff] }
 0x37b   :  { %1492 = vtanh.f32 %v421_v45  ;;  %v1045_v45 = vld [vmem:[#allocation9 + $0x30] sm:$0xff] }
 0x385   :  { %v1493_v47 = vpop.eup %1492 }
 0x386   :  { %1329 = vmatmul.mubr.msk.f32.vlgmr.msra.gmra.mrb[2].mxu1 %vm197_vm1, %v1493_v47  ;;  %v1461_v47 = vpack.c.bf16 %v1046_v46, %v1045_v45 }
 0x387   :  { %1435 = vmatpush3.bf16.msra.mxu1 %v1797_v9  ;;  %1342 = vmatprep.mubr.msk.f32.mxu1 %vm1650_vm0, %v1651_v3 }
 0x388   :  { %1439 = vmatprep.subr.bf16.mxu1 %v1649_v2 }
 0x459   :  { %v492_v53 = vpop.f32.mrb[2].mxu1 }
 0x45a   :  { %v496_v54 = vadd.f32 %v492_v53, %v192_v52  ;;  %v1330_v55 = vpop.f32.mrb[3].mxu1  ;;  %v1467_v52 = vpack.c.bf16 %v1132_v51, %v1131_v50  ;;  %v1133_v53 = vld [vmem:[#allocation11 + $0x20] sm:$0xff] }
 0x45c   :  { %1494 = vtanh.f32 %v496_v54  ;;  %v1134_v54 = vld [vmem:[#allocation11 + $0x28] sm:$0xff] }
 0x45d   :  { %v1470_v55 = vpack.c.bf16 %v1134_v54, %v1133_v53 }
 0x466   :  { %v1495_v56 = vpop.eup %1494 }
 0x467   :  { %1336 = vmatmul.mubr.msk.f32.vlgmr.msra.gmra.mrb[4].mxu0 %vm197_vm1, %v1495_v56 }
 0x468   :  { %1438 = vmatpush3.bf16.msra.mxu0 %v1797_v9  ;;  %1349 = vmatprep.mubr.msk.f32.mxu0 %vm1650_vm0, %v1651_v3  ;;  %v180_v9 = vmul.f32 %v1814_v15, %v160_v8  ;;  %v1452_v15 = vpack.c.bf16 %v1040_v35, %v1039_v34 }
 0x469   :  { %1442 = vmatprep.subr.bf16.mxu0 %v1649_v2 }
 0x46a   :  { %v194_v10 = vadd.f32 %v1816_v16, %v180_v9 }
 0x53a   :  { %v567_v62 = vpop.f32.mrb[4].mxu0 }
 0x53b   :  { %v571_v63 = vadd.f32 %v567_v62, %v193_v61  ;;  %v1337_v0 = vpop.f32.mrb[5].mxu0 }
 0x53d   :  { %1496 = vtanh.f32 %v571_v63 }
 0x547   :  { %v1497_v4 = vpop.eup %1496 }
 0x548   :  { %1343 = vmatmul.mubr.msk.f32.vlgmr.msra.gmra.mrb[4].mxu1 %vm197_vm1, %v1497_v4 }
 0x549   :  { %1356 = vmatprep.mubr.msk.f32.mxu1 %vm1650_vm0, %v1651_v3  ;;  %1441 = vmatpush3.bf16.msra.mxu1 %v1440_v5 }
 0x54a   :  { %1445 = vmatprep.subr.bf16.mxu1 %v1649_v2 }
 0x61b   :  { %v642_v11 = vpop.f32.mrb[4].mxu1 }
 0x61c   :  { %v646_v12 = vadd.f32 %v642_v11, %v194_v10  ;;  %v1344_v13 = vpop.f32.mrb[5].mxu1  ;;  %v1136_v10 = vld [vmem:[#allocation11 + $0x38] sm:$0xff] }
 0x61e   :  { %1498 = vtanh.f32 %v646_v12  ;;  %v1248_v12 = vld [vmem:[%s1929_s8] ss:$0 sm:$0xff] }
 0x628   :  { %v1499_v14 = vpop.eup %1498 }
 0x629   :  { %1350 = vmatmul.mubr.msk.f32.vlgmr.msra.gmra.mrb[6].mxu0 %vm197_vm1, %v1499_v14 }
 0x62a   :  { %1363 = vmatprep.mubr.msk.f32.mxu0 %vm1650_vm0, %v1651_v3  ;;  %1444 = vmatpush3.bf16.msra.mxu0 %v1443_v20 }
 0x62b   :  { %1448 = vmatprep.subr.bf16.mxu0 %v1649_v2 }
 0x6fc   :  { %v717_v24 = vpop.f32.mrb[6].mxu0 }
 0x6fd   :  { %v721_v25 = vadd.f32 %v717_v24, %v195_v23  ;;  %v1351_v26 = vpop.f32.mrb[7].mxu0 }
 0x6ff   :  { %1500 = vtanh.f32 %v721_v25 }
 0x709   :  { %v1501_v27 = vpop.eup %1500 }
 0x70a   :  { %723 = vst.msk [vmem:[#allocation2] sm:$0xff] %vm197_vm1, %v1501_v27 }
 0x711   :  { %v727_v36 = vld [vmem:[#allocation2 + $0x2] sm:$0x3]  ;;  %v724_v37 = vld [vmem:[#allocation2] sm:$0x3]  ;;  %v876_v16 = vld [vmem:[#allocation2 + $0x4] sm:$0x3] }
 0x712   :  { %1357 = vmatmul.mubr.msk.f32.vlgmr.msra.gmra.mrb[6].mxu1 %vm197_vm1, %v727_v36  ;;  %1364 = vmatmul.mubr.msk.f32.vlgmr.msra.gmra.mrb[8].mxu0 %vm197_vm1, %v724_v37  ;;  %v953_v38 = vld [vmem:[#allocation2 + $0x6] sm:$0x3] }
 0x713   :  { %1447 = vmatpush3.bf16.msra.mxu1 %v1446_v32  ;;  %1450 = vmatpush3.bf16.msra.mxu0 %v1449_v33 }
 0x714   :  { %1370 = vmatprep.mubr.msk.f32.mxu1 %vm1650_vm0, %v1651_v3  ;;  %1377 = vmatprep.mubr.msk.f32.mxu0 %vm1650_vm0, %v1651_v3 }
 0x715   :  { %1451 = vmatprep.subr.bf16.mxu1 %v1649_v2  ;;  %1463 = vmatprep.subr.bf16.mxu0 %v1649_v2 }
 0x716   :  { %1371 = vmatmul.mubr.msk.f32.vlgmr.msra.gmra.mrb[8].mxu1 %vm197_vm1, %v876_v16  ;;  %1378 = vmatmul.mubr.msk.f32.vlgmr.msra.gmra.mrb[10].mxu0 %vm197_vm1, %v953_v38 }
 0x717   :  { %1453 = vmatpush3.bf16.msra.mxu1 %v1452_v15  ;;  %1396 = vmatprep.mubr.msk.f32.mxu1 %vm1650_vm0, %v1651_v3 }
 0x718   :  { %1454 = vmatprep.subr.bf16.mxu1 %v1649_v2  ;;  %1415 = vmatprep.mubr.msk.f32.mxu0 %vm1650_vm0, %v1651_v3  ;;  %v1464_v3 = vpack.c.bf16 %v1130_v49, %v1129_v48 }
 0x71a   :  { %1465 = vmatpush3.bf16.msra.mxu0 %v1464_v3 }
 0x71b   :  { %1456 = vmatpush3.bf16.msra.mxu1 %v1455_v41  ;;  %1466 = vmatprep.subr.bf16.mxu0 %v1649_v2 }
 0x71c   :  { %1457 = vmatprep.subr.bf16.mxu1 %v1649_v2 }
 0x71e   :  { %1468 = vmatpush3.bf16.msra.mxu0 %v1467_v52 }
 0x71f   :  { %1459 = vmatpush3.bf16.msra.mxu1 %v1458_v44  ;;  %1469 = vmatprep.subr.bf16.mxu0 %v1649_v2 }
 0x720   :  { %1460 = vmatprep.subr.bf16.mxu1 %v1649_v2 }
 0x722   :  { %1471 = vmatpush3.bf16.msra.mxu0 %v1470_v55 }
 0x723   :  { %1462 = vmatpush3.bf16.msra.mxu1 %v1461_v47  ;;  %1472 = vmatprep.subr.bf16.mxu0 %v1649_v2  ;;  %v1135_v2 = vld [vmem:[#allocation11 + $0x30] sm:$0xff] }
 0x724   :  { %v1473_v11 = vpack.c.bf16 %v1136_v10, %v1135_v2 }
 0x726   :  { %1474 = vmatpush3.bf16.msra.mxu0 %v1473_v11 }
 0x7e5   :  { %v799_v56 = vpop.f32.mrb[6].mxu1  ;;  %v872_v57 = vpop.f32.mrb[8].mxu0 }
 0x7e6   :  { %v873_v58 = vadd.f32 %v872_v57, %v799_v56  ;;  %v1358_v59 = vpop.f32.mrb[7].mxu1  ;;  %v1365_v60 = vpop.f32.mrb[9].mxu0 }
 0x7e9   :  { %v948_v61 = vpop.f32.mrb[8].mxu1  ;;  %v1025_v62 = vpop.f32.mrb[10].mxu0 }
 0x7ea   :  { %v952_v63 = vadd.f32 %v948_v61, %v873_v58  ;;  %v1372_v0 = vpop.f32.mrb[9].mxu1  ;;  %v1379_v4 = vpop.f32.mrb[11].mxu0 }
 0x7ec   :  { %v1029_v7 = vadd.f32 %v1025_v62, %v952_v63 }
 0x7ee   :  { %v1037_v8 = vadd.f32 %v1247_v6, %v1029_v7 }
 0x7f0   :  { %v1038_v9 = vmax.f32 %v1037_v8, 0.0 }
 0x7f2   :  { %1397 = vmatmul.mubr.msk.f32.vlgmr.msra.gmra.mrb[10].mxu1 %vm1054_vm2, %v1038_v9 }
 0x8c5   :  { %v1124_v13 = vpop.f32.mrb[10].mxu1 }
 0x8c6   :  { %v1125_v14 = vadd.f32 %v1248_v12, %v1124_v13  ;;  %v1398_v17 = vpop.f32.mrb[11].mxu1 }
 0x8c8   :  { %v1128_v1 = vmax.f32 %v1125_v14, 0.0 }
 0x8ca   :  { %1416 = vmatmul.mubr.msk.f32.vlgmr.msra.gmra.mrb[12].mxu0 %vm1054_vm2, %v1128_v1 }
 0x99d   :  { %v1213_v5 = vpop.f32.mrb[12].mxu0 }
 0x99e   :  { %v1214_v19 = vadd.f32 %v1250_v18, %v1213_v5  ;;  %v1417_v20 = vpop.f32.mrb[13].mxu0 }
 0x9a0   :  { %1217 = vst [vmem:[#allocation12] sm:$0x3] %v1214_v19 }
 0x9a1   :  { %1623 = shalt.err (!%p1620_p2)
}
 0x9a2   :  { %s1624_s15 = scalar_lea.hbm %s1932_s11, 32 }
 0x9a3   :  { %p1625_p3 = scmp.ne.s32.totalorder %s1932_s11, %s1624_s15  ;;  %p1628_p4 = scmp.lt.u32.totalorder %s1624_s15, %s1932_s11 }
 0x9a5   :  { %p1630_p5 = pnand %p1628_p4, %p1625_p3 }
 0x9a7   :  { %1633 = shalt.err (!%p1630_p5)
}
 0x9a8   :  { %1227 = dma.vmem_to_hbm [thread:$0]  %s1225_s26, 32, %s1932_s11, [#allocation5]  }
 0x9a9   :  { %1640 = dma.done.wait [#allocation5], 32  }
 0x9aa   :  { %1641 = vsyncadd [#allocation5], 4294967264 }
 0x9ab   :  { %1231 = vsyncpa [#allocation4], 1 }
 0x9ac   :  { %1232 = vsyncpa [#allocation7], 1 }
 0x9ad   :  { %1233 = vsyncpa [#allocation10], 1 }
 0x9ae   :  { %1234 = vsyncpa [#allocation5], 1 }

</bundles_post_ra>
